<compile_context>
chip_gen: v6e
topology: v6e:2x2x1
jax: 0.10.0
libtpu: 0.0.40
codegen_flags: <defaults>
</compile_context>

<pallas_src>
import functools

import jax
import jax.numpy as jnp
from jax.experimental import pallas as pl
from jax.experimental.pallas import tpu as pltpu

H1 = 512       # fc_encode1 output features (only used for init / fusion)
H2 = 4096      # fc_encode3 output features
SUBLANE = 8


def _round_up(x, m):
    return (x + m - 1) // m * m


def _tpu_budget():
    """Per-generation (vmem_limit_bytes, default block_b)."""
    try:
        vmem = pltpu.get_tpu_info().vmem_capacity_bytes
    except Exception:
        vmem = 64 * 1024 * 1024
    if vmem >= 100 * 1024 * 1024:        # v5e / v6e: 128 MiB per TensorCore
        return 100 * 1024 * 1024, 512
    return 48 * 1024 * 1024, 256         # v7x: 64 MiB per TensorCore


def _pick_batch_tile(B, block_b):
    """Batch tile: <= block_b, >= 2 tiles whenever B > 8 (both v7x TCs get work)."""
    if B <= SUBLANE:
        return SUBLANE
    n_tiles = max(2, pl.cdiv(B, block_b))
    return _round_up(pl.cdiv(B, n_tiles), SUBLANE)


def prepare_params(w1, b1, w2, b2, *, compute_dtype=jnp.bfloat16):
    """Fuse the two Linears once (call OUTSIDE the hot path).

    w1: (code_len, 512), b1: (512,), w2: (512, 4096), b2: (4096,) -- weights are
    stored transposed relative to PyTorch (in, out) so the kernel computes
    x @ W + b.  Returns (wf, bf): wf (code_len, 4096) in compute_dtype,
    bf (1, 4096) kept in f32 so the bias add stays f32.
    """
    wf = jnp.dot(w1.astype(jnp.float32), w2.astype(jnp.float32),
                 preferred_element_type=jnp.float32)
    bf = jnp.dot(b1.astype(jnp.float32), w2.astype(jnp.float32),
                 preferred_element_type=jnp.float32) + b2.astype(jnp.float32)
    return wf.astype(compute_dtype), bf.reshape(1, H2)


def _geimgnet_kernel(x_ref, wf_ref, bf_ref, hid_ref, code_ref, *, alpha):
    # (tb, code_len) @ (code_len, 4096) on the MXU, f32 accumulation.
    hid = jnp.dot(x_ref[...], wf_ref[...], preferred_element_type=jnp.float32)
    hid = hid + bf_ref[...]                      # (1, 4096) broadcasts over rows
    hid_ref[...] = hid.astype(hid_ref.dtype)

    if alpha != 1.0:  # static Python branch: no VPU multiply when alpha == 1.0
        hid = hid * alpha
    code_ref[...] = jnp.maximum(hid, 0.0).astype(code_ref.dtype)


def geimgnet_forward(x, wf, bf, *, alpha=1.0, block_b=None,
                     out_dtype=jnp.bfloat16):
    """x: (B, code_len); (wf, bf) from prepare_params().

    Returns (x, hid, code) exactly like GeImgNet.forward (hid/code in out_dtype).
    """
    B, code_len = x.shape
    assert wf.shape == (code_len, H2)
    assert bf.shape == (1, H2)
    compute_dtype = wf.dtype

    vmem_limit, default_block_b = _tpu_budget()
    if block_b is None:
        block_b = default_block_b

    tb = _pick_batch_tile(B, block_b)
    bp = _round_up(B, tb)
    grid = (bp // tb,)

    # Per-call prep is just the compute-dtype cast (+ small batch-row pad);
    # no K padding and no per-call weight work.
    xc = x.astype(compute_dtype)
    if bp != B:
        xc = jnp.pad(xc, ((0, bp - B), (0, 0)))

    kernel = functools.partial(_geimgnet_kernel, alpha=float(alpha))

    in_itemsize = jnp.dtype(compute_dtype).itemsize
    out_itemsize = jnp.dtype(out_dtype).itemsize
    flops = 2 * bp * code_len * H2
    bytes_accessed = ((bp * code_len + code_len * H2) * in_itemsize  # x, Wf
                      + H2 * 4                                       # bf
                      + 2 * bp * H2 * out_itemsize)                  # hid, code

    hid, code = pl.pallas_call(
        kernel,
        out_shape=(jax.ShapeDtypeStruct((bp, H2), out_dtype),
                   jax.ShapeDtypeStruct((bp, H2), out_dtype)),
        grid_spec=pltpu.PrefetchScalarGridSpec(
            num_scalar_prefetch=0,
            grid=grid,
            in_specs=[
                pl.BlockSpec((tb, code_len), lambda i: (i, 0)),  # x: streamed over batch
                pl.BlockSpec((code_len, H2), lambda i: (0, 0)),  # fused W: VMEM-resident
                pl.BlockSpec((1, H2), lambda i: (0, 0)),         # fused bias (f32)
            ],
            out_specs=[
                pl.BlockSpec((tb, H2), lambda i: (i, 0)),        # hid
                pl.BlockSpec((tb, H2), lambda i: (i, 0)),        # code
            ],
        ),
        compiler_params=pltpu.CompilerParams(
            dimension_semantics=("parallel",),   # batch tiles split across TCs (v7x)
            vmem_limit_bytes=vmem_limit,
        ),
        cost_estimate=pl.CostEstimate(flops=flops, transcendentals=0,
                                      bytes_accessed=bytes_accessed),
    )(xc, wf, bf)

    # Slice back to the logical batch; x passes through untouched (per the module).
    return x, hid[:B], code[:B]


def init_params(key, code_len):
    """Deterministic init matching nn.Linear(code_len, 512) / nn.Linear(512, 4096).

    PyTorch stores weight as (out, in); we keep the transpose (in, out) for x @ W.
    """
    k1, k2, k3, k4 = jax.random.split(key, 4)
    bound1 = 1.0 / (code_len ** 0.5)
    w1 = jax.random.uniform(k1, (code_len, H1), jnp.float32, minval=-bound1, maxval=bound1)
    b1 = jax.random.uniform(k2, (H1,), jnp.float32, minval=-bound1, maxval=bound1)
    bound2 = 1.0 / (H1 ** 0.5)
    w2 = jax.random.uniform(k3, (H1, H2), jnp.float32, minval=-bound2, maxval=bound2)
    b2 = jax.random.uniform(k4, (H2,), jnp.float32, minval=-bound2, maxval=bound2)
    return w1, b1, w2, b2


if __name__ == "__main__":
    key = jax.random.PRNGKey(0)
    k_x, k_p = jax.random.split(key)

    code_len = 32      # small synthetic code length
    batch = 2

    x = jax.random.normal(k_x, (batch, code_len), jnp.float32)
    w1, b1, w2, b2 = init_params(k_p, code_len)

    # Plain-JAX reference (unfused, f32), matching the PyTorch module.
    hid_ref = (x @ w1 + b1) @ w2 + b2
    code_ref = jnp.maximum(1.0 * hid_ref, 0.0)

    # ---- default fast path: bf16 MXU inputs + bf16 outputs -----------------
    wf_bf16, bf_f32 = prepare_params(w1, b1, w2, b2, compute_dtype=jnp.bfloat16)
    x_out, hid_bf, code_bf = geimgnet_forward(x, wf_bf16, bf_f32, alpha=1.0)
    jax.block_until_ready((x_out, hid_bf, code_bf))

    assert x_out.shape == x.shape
    assert hid_bf.shape == hid_ref.shape and code_bf.shape == code_ref.shape
    assert float(jnp.max(jnp.abs(x_out - x))) == 0.0
    assert bool(jnp.allclose(hid_bf.astype(jnp.float32), hid_ref, atol=3e-2, rtol=3e-2))
    assert bool(jnp.allclose(code_bf.astype(jnp.float32), code_ref, atol=3e-2, rtol=3e-2))

    # ---- f32 path for a tight numerical check -------------------------------
    wf_f32, bf32 = prepare_params(w1, b1, w2, b2, compute_dtype=jnp.float32)
    _, hid_f32, code_f32 = geimgnet_forward(x, wf_f32, bf32, alpha=1.0,
                                            out_dtype=jnp.float32)
    jax.block_until_ready((hid_f32, code_f32))
    assert float(jnp.max(jnp.abs(hid_f32 - hid_ref))) < 1e-3
    assert float(jnp.max(jnp.abs(code_f32 - code_ref))) < 1e-3

    print("KERNEL_OK")
</pallas_src>

<mosaic_0001>
module attributes {stable_mosaic.version = 11 : i64} {
  func.func @_geimgnet_kernel(%arg0: i32, %arg1: memref<8x32xbf16, #tpu.memory_space<vmem>>, %arg2: memref<32x4096xbf16, #tpu.memory_space<vmem>>, %arg3: memref<1x4096xf32, #tpu.memory_space<vmem>>, %arg4: memref<8x4096xbf16, #tpu.memory_space<vmem>>, %arg5: memref<8x4096xbf16, #tpu.memory_space<vmem>>) attributes {dimension_semantics = [#tpu.dimension_semantics<parallel>], iteration_bounds = array<i64: 1>, scalar_prefetch = 0 : i64, scratch_operands = 0 : i64, tpu.core_type = #tpu.core_type<tc>, window_params = [{transform_indices = @transform_0, window_bounds = array<i64: 8, 32>}, {pipeline_mode = #tpu.pipeline_mode<synchronous>, transform_indices = @transform_1, window_bounds = array<i64: 32, 4096>}, {pipeline_mode = #tpu.pipeline_mode<synchronous>, transform_indices = @transform_2, window_bounds = array<i64: 1, 4096>}, {transform_indices = @transform_3, window_bounds = array<i64: 8, 4096>}, {transform_indices = @transform_4, window_bounds = array<i64: 8, 4096>}]} {
    %c0 = arith.constant 0 : index
    %c0_0 = arith.constant 0 : index
    %0 = vector.load %arg1[%c0, %c0_0] : memref<8x32xbf16, #tpu.memory_space<vmem>>, vector<8x32xbf16>
    %c0_1 = arith.constant 0 : index
    %c0_2 = arith.constant 0 : index
    %1 = vector.load %arg2[%c0_1, %c0_2] : memref<32x4096xbf16, #tpu.memory_space<vmem>>, vector<32x4096xbf16>
    %cst = arith.constant dense<0.000000e+00> : vector<8x4096xf32>
    %2 = tpu.matmul %0, %1, %cst {dimension_numbers = #tpu.dot_dimension_numbers<[1], [0], [0], [1], [0, 0, 1, 1], [], []>} : vector<8x32xbf16>, vector<32x4096xbf16>, vector<8x4096xf32> -> vector<8x4096xf32>
    %c0_3 = arith.constant 0 : index
    %c0_4 = arith.constant 0 : index
    %3 = vector.load %arg3[%c0_3, %c0_4] : memref<1x4096xf32, #tpu.memory_space<vmem>>, vector<1x4096xf32>
    %4 = vector.broadcast %3 : vector<1x4096xf32> to vector<8x4096xf32>
    %5 = arith.addf %2, %4 : vector<8x4096xf32>
    %6 = arith.truncf %5 : vector<8x4096xf32> to vector<8x4096xbf16>
    %c0_5 = arith.constant 0 : index
    %c0_6 = arith.constant 0 : index
    %7 = vector.load %arg4[%c0_5, %c0_6] : memref<8x4096xbf16, #tpu.memory_space<vmem>>, vector<8x4096xbf16>
    tpu.vector_store %arg4[%c0_5, %c0_6], %6 {strides = array<i32>} : memref<8x4096xbf16, #tpu.memory_space<vmem>>, vector<8x4096xbf16>,
    %cst_7 = arith.constant 0.000000e+00 : f32
    %8 = vector.broadcast %cst_7 : f32 to vector<8x4096xf32>
    %9 = arith.maximumf %5, %8 : vector<8x4096xf32>
    %10 = arith.truncf %9 : vector<8x4096xf32> to vector<8x4096xbf16>
    %c0_8 = arith.constant 0 : index
    %c0_9 = arith.constant 0 : index
    %11 = vector.load %arg5[%c0_8, %c0_9] : memref<8x4096xbf16, #tpu.memory_space<vmem>>, vector<8x4096xbf16>
    tpu.vector_store %arg5[%c0_8, %c0_9], %10 {strides = array<i32>} : memref<8x4096xbf16, #tpu.memory_space<vmem>>, vector<8x4096xbf16>,
    return
  }
  func.func @transform_0(%arg0: i32) -> (i32, i32) {
    %c0_i32 = arith.constant 0 : i32
    %c0_i32_0 = arith.constant 0 : i32
    return %arg0, %c0_i32 : i32, i32
  }
  func.func @transform_1(%arg0: i32) -> (i32, i32) {
    %c0_i32 = arith.constant 0 : i32
    %c0_i32_0 = arith.constant 0 : i32
    %c0_i32_1 = arith.constant 0 : i32
    return %c0_i32, %c0_i32_0 : i32, i32
  }
  func.func @transform_2(%arg0: i32) -> (i32, i32) {
    %c0_i32 = arith.constant 0 : i32
    %c0_i32_0 = arith.constant 0 : i32
    %c0_i32_1 = arith.constant 0 : i32
    return %c0_i32, %c0_i32_0 : i32, i32
  }
  func.func @transform_3(%arg0: i32) -> (i32, i32) {
    %c0_i32 = arith.constant 0 : i32
    %c0_i32_0 = arith.constant 0 : i32
    return %arg0, %c0_i32 : i32, i32
  }
  func.func @transform_4(%arg0: i32) -> (i32, i32) {
    %c0_i32 = arith.constant 0 : i32
    %c0_i32_0 = arith.constant 0 : i32
    return %arg0, %c0_i32 : i32, i32
  }
}

</mosaic_0001>

<bundles_post_ra>
// kernel: tpu_custom_call.1
= control target key start
LH: loop header
LB: loop body
LE: loop exit
PB: predicated region body
PF: predicated region fallthrough
CT: control target
= control target key end

     0   :  { %10 = vsyncpa [#allocation3], 0  ;;  %s2025_s0 = inlined_call_operand.hbm [shape: bf16[8,32], index: 0, kind: input, shape index: {}]   ;;  %s2026_s1 = inlined_call_operand.hbm [shape: bf16[32,4096], index: 1, kind: input, shape index: {}]   ;;  %s2027_s2 = inlined_call_operand.hbm [shape: f32[1,4096], index: 2, kind: input, shape index: {}]   ;;  %s2028_s3 = inlined_call_operand.hbm [shape: bf16[8,4096], index: 3, kind: output, shape index: {0}]   ;;  %s2029_s4 = inlined_call_operand.hbm [shape: bf16[8,4096], index: 4, kind: output, shape index: {1}]  }
   0x1   :  { %11 = vsyncpa [#allocation6], 0 }
   0x2   :  { %12 = vsyncpa [#allocation4], 0 }
   0x3   :  { %13 = vsyncpa [#allocation10], 0  ;;  %s1879_s15 = smov [#allocation5]  }
   0x4   :  { %s29_s16 = sshll.u32 %s1879_s15, 4  ;;  %s30_s16 = int_to_ptr.vmem [resolvable:$true] %s29_s16 }
   0x5   :  { %s1779_s17 = scalar_lea.vmem %s30_s16, 8192  ;;  %p1784_p1 = scmp.lt.s32.totalorder %s30_s16, %s30_s16 }
   0x6   :  { %p1780_p0 = scmp.ne.s32.totalorder %s30_s16, %s1779_s17  ;;  %p1785_p2 = scmp.lt.s32.totalorder %s1779_s17, %s1779_s17 }
   0x8   :  { %p1786_p3 = por %p1785_p2, %p1784_p1 }
   0xa   :  { %p1787_p4 = pnand %p1786_p3, %p1780_p0 }
   0xc   :  { %1790 = shalt.err (!%p1787_p4)
}
   0xd   :  { %s1880_s18 = smov 2048   ;;  %s1881_s19 = smov 128  }
   0xe   :  { %35 = dma.hbm_to_vmem [thread:$0]  %s2026_s1, 8192, %s30_s16, [#allocation6], %s1880_s18, %s1880_s18, %s1881_s19  }
   0xf   :  { %s1882_s22 = smov [#allocation2]   ;;  %s1883_s24 = smov [#allocation7]  }
  0x10   :  { %s20_s23 = sshll.u32 %s1882_s22, 4  ;;  %s42_s25 = sshll.u32 %s1883_s24, 4  ;;  %s21_s23 = int_to_ptr.vmem [resolvable:$true] %s20_s23  ;;  %s43_s25 = int_to_ptr.vmem [resolvable:$true] %s42_s25 }
  0x11   :  { %s1799_s26 = scalar_lea.vmem %s21_s23, 64  ;;  %p1804_p6 = scmp.lt.s32.totalorder %s21_s23, %s21_s23 }
  0x12   :  { %p1800_p5 = scmp.ne.s32.totalorder %s21_s23, %s1799_s26  ;;  %p1805_p7 = scmp.lt.s32.totalorder %s1799_s26, %s1799_s26 }
  0x14   :  { %p1806_p8 = por %p1805_p7, %p1804_p6 }
  0x16   :  { %p1807_p9 = pnand %p1806_p8, %p1800_p5 }
  0x18   :  { %1810 = shalt.err (!%p1807_p9)
}
  0x19   :  { %23 = dma.hbm_to_vmem [thread:$0]  %s2025_s0, 64, %s21_s23, [#allocation3]  }
  0x1a   :  { %s1819_s29 = scalar_lea.vmem %s43_s25, 512  ;;  %p1824_p11 = scmp.lt.s32.totalorder %s43_s25, %s43_s25 }
  0x1b   :  { %p1820_p10 = scmp.ne.s32.totalorder %s43_s25, %s1819_s29  ;;  %p1825_p12 = scmp.lt.s32.totalorder %s1819_s29, %s1819_s29 }
  0x1d   :  { %p1826_p13 = por %p1825_p12, %p1824_p11 }
  0x1f   :  { %p1827_p0 = pnand %p1826_p13, %p1820_p10 }
  0x21   :  { %1830 = shalt.err (!%p1827_p0)
}
  0x22   :  { %45 = dma.hbm_to_vmem [thread:$0]  %s2027_s2, 512, %s43_s25, [#allocation6]  }
  0x23   :  { %1871 = dma.done.wait [#allocation3], 64  }
  0x24   :  { %1872 = vsyncadd [#allocation3], 4294967232 }
  0x25   :  { %1873 = dma.done.wait [#allocation6], 8704  }
  0x26   :  { %1874 = vsyncadd [#allocation6], 4294958592  ;;  %v1884_v0 = vmov 0   ;;  %v89_v1 = vld [vmem:[#allocation5 + $0x100] sm:$0xff]  ;;  %v90_v3 = vld [vmem:[#allocation5 + $0x108] sm:$0xff]  ;;  %vm609_vm0 = vcmask 261120  }
  0x27   :  { %645 = vmatprep.mubr.bf16.mxu0 %v1884_v0  ;;  %686 = vmatprep.mubr.bf16.mxu1 %v1884_v0  ;;  %v105_v2 = vld [vmem:[#allocation5 + $0x180] sm:$0xff]  ;;  %v106_v5 = vld [vmem:[#allocation5 + $0x188] sm:$0xff]  ;;  %v91_v15 = vld [vmem:[#allocation5 + $0x110] sm:$0xff]  ;;  %s1885_s0 = smov [#allocation8]   ;;  %s1886_s5 = smov [#allocation9]  }
  0x28   :  { %v1652_v4 = vcombine.high %v89_v1, %v105_v2  ;;  %v1651_v6 = vcombine.low %v89_v1, %v105_v2  ;;  %v57_v7 = vld [vmem:[#allocation5] sm:$0xff]  ;;  %v1654_v9 = vcombine.high %v90_v3, %v106_v5  ;;  %v1653_v10 = vcombine.low %v90_v3, %v106_v5  ;;  %v58_v12 = vld [vmem:[#allocation5 + $0x8] sm:$0xff]  ;;  %v107_v16 = vld [vmem:[#allocation5 + $0x190] sm:$0xff]  ;;  %s1595_s2 = sshll.u32 %s1885_s0, 4  ;;  %s1605_s6 = sshll.u32 %s1886_s5, 4  ;;  %s1596_s2 = int_to_ptr.vmem [resolvable:$true] %s1595_s2  ;;  %s1606_s6 = int_to_ptr.vmem [resolvable:$true] %s1605_s6 }
  0x29   :  { %v73_v8 = vld [vmem:[#allocation5 + $0x80] sm:$0xff]  ;;  %v74_v13 = vld [vmem:[#allocation5 + $0x88] sm:$0xff]  ;;  %v92_v17 = vld [vmem:[#allocation5 + $0x118] sm:$0xff]  ;;  %v1656_v21 = vcombine.high %v91_v15, %v107_v16  ;;  %v1655_v28 = vcombine.low %v91_v15, %v107_v16  ;;  %s1831_s7 = scalar_lea.vmem %s1596_s2, 2048  ;;  %p1836_p2 = scmp.lt.s32.totalorder %s1596_s2, %s1596_s2 }
  0x2a   :  { %v1620_v11 = vcombine.high %v57_v7, %v73_v8  ;;  %625 = vmatprep.subr.bf16.mxu0 %v1652_v4  ;;  %v1622_v14 = vcombine.high %v58_v12, %v74_v13  ;;  %666 = vmatprep.subr.bf16.mxu1 %v1654_v9  ;;  %v1619_v18 = vcombine.low %v57_v7, %v73_v8  ;;  %v108_v19 = vld [vmem:[#allocation5 + $0x198] sm:$0xff]  ;;  %v59_v23 = vld [vmem:[#allocation5 + $0x10] sm:$0xff]  ;;  %v93_v32 = vld [vmem:[#allocation5 + $0x120] sm:$0xff]  ;;  %p1832_p1 = scmp.ne.s32.totalorder %s1596_s2, %s1831_s7  ;;  %p1837_p3 = scmp.lt.s32.totalorder %s1831_s7, %s1831_s7 }
  0x2b   :  { %626 = vmatpush1.bf16.msra.mxu0 %v1651_v6  ;;  %667 = vmatpush1.bf16.msra.mxu1 %v1653_v10  ;;  %v1621_v20 = vcombine.low %v58_v12, %v74_v13  ;;  %v1658_v22 = vcombine.high %v92_v17, %v108_v19  ;;  %v75_v24 = vld [vmem:[#allocation5 + $0x90] sm:$0xff]  ;;  %v60_v25 = vld [vmem:[#allocation5 + $0x18] sm:$0xff]  ;;  %v1657_v29 = vcombine.low %v92_v17, %v108_v19  ;;  %v109_v33 = vld [vmem:[#allocation5 + $0x1a0] sm:$0xff] }
  0x2c   :  { %627 = vmatprep.subr.bf16.mxu0 %v1620_v11  ;;  %668 = vmatprep.subr.bf16.mxu1 %v1622_v14  ;;  %v76_v26 = vld [vmem:[#allocation5 + $0x98] sm:$0xff]  ;;  %v1624_v30 = vcombine.high %v59_v23, %v75_v24  ;;  %v94_v34 = vld [vmem:[#allocation5 + $0x128] sm:$0xff]  ;;  %v1623_v36 = vcombine.low %v59_v23, %v75_v24  ;;  %v1660_v38 = vcombine.high %v93_v32, %v109_v33  ;;  %v61_v40 = vld [vmem:[#allocation5 + $0x20] sm:$0xff]  ;;  %p1838_p4 = por %p1837_p3, %p1836_p2 }
  0x2d   :  { %v1923_v27 = vld [vmem:[#allocation2] sm:$0xf]  ;;  %v1626_v31 = vcombine.high %v60_v25, %v76_v26  ;;  %v110_v35 = vld [vmem:[#allocation5 + $0x1a8] sm:$0xff]  ;;  %v1625_v37 = vcombine.low %v60_v25, %v76_v26  ;;  %v77_v41 = vld [vmem:[#allocation5 + $0xa0] sm:$0xff]  ;;  %v1659_v44 = vcombine.low %v93_v32, %v109_v33 }
  0x2e   :  { %v1662_v39 = vcombine.high %v94_v34, %v110_v35  ;;  %v62_v42 = vld [vmem:[#allocation5 + $0x28] sm:$0xff]  ;;  %v1661_v45 = vcombine.low %v94_v34, %v110_v35  ;;  %v1628_v46 = vcombine.high %v61_v40, %v77_v41  ;;  %v95_v48 = vld [vmem:[#allocation5 + $0x130] sm:$0xff]  ;;  %v96_v50 = vld [vmem:[#allocation5 + $0x138] sm:$0xff]  ;;  %v1627_v52 = vcombine.low %v61_v40, %v77_v41  ;;  %p1839_p5 = pnand %p1838_p4, %p1832_p1 }
  0x2f   :  { %628 = vmatpush1.bf16.msra.mxu0 %v1619_v18  ;;  %669 = vmatpush1.bf16.msra.mxu1 %v1621_v20  ;;  %v78_v43 = vld [vmem:[#allocation5 + $0xa8] sm:$0xff]  ;;  %v111_v49 = vld [vmem:[#allocation5 + $0x1b0] sm:$0xff]  ;;  %v112_v51 = vld [vmem:[#allocation5 + $0x1b8] sm:$0xff] }
  0x30   :  { %707 = vmatprep.subr.bf16.mxu0 %v1656_v21  ;;  %748 = vmatprep.subr.bf16.mxu1 %v1658_v22  ;;  %v1630_v47 = vcombine.high %v62_v42, %v78_v43  ;;  %v1629_v53 = vcombine.low %v62_v42, %v78_v43  ;;  %v1664_v54 = vcombine.high %v95_v48, %v111_v49  ;;  %v63_v56 = vld [vmem:[#allocation5 + $0x30] sm:$0xff]  ;;  %v64_v58 = vld [vmem:[#allocation5 + $0x38] sm:$0xff]  ;;  %v97_v1 = vld [vmem:[#allocation5 + $0x140] sm:$0xff] }
  0x31   :  { %v1666_v55 = vcombine.high %v96_v50, %v112_v51  ;;  %v79_v57 = vld [vmem:[#allocation5 + $0xb0] sm:$0xff]  ;;  %v80_v59 = vld [vmem:[#allocation5 + $0xb8] sm:$0xff]  ;;  %v1663_v60 = vcombine.low %v95_v48, %v111_v49  ;;  %v1665_v61 = vcombine.low %v96_v50, %v112_v51  ;;  %v113_v2 = vld [vmem:[#allocation5 + $0x1c0] sm:$0xff] }
  0x32   :  { %1683 = vmatmul.mubr.msk.bf16.vlgmr.msra.gmra.mxu0 %vm609_vm0, %v1923_v27  ;;  %1684 = vmatmul.mubr.msk.bf16.vlgmr.msra.gmra.mxu1 %vm609_vm0, %v1923_v27  ;;  %v1632_v62 = vcombine.high %v63_v56, %v79_v57  ;;  %v1634_v63 = vcombine.high %v64_v58, %v80_v59  ;;  %v98_v3 = vld [vmem:[#allocation5 + $0x148] sm:$0xff]  ;;  %v1631_v5 = vcombine.low %v63_v56, %v79_v57  ;;  %v65_v9 = vld [vmem:[#allocation5 + $0x40] sm:$0xff]  ;;  %v99_v17 = vld [vmem:[#allocation5 + $0x150] sm:$0xff] }
  0x33   :  { %708 = vmatpush1.bf16.msra.mxu0 %v1655_v28  ;;  %749 = vmatpush1.bf16.msra.mxu1 %v1657_v29  ;;  %v114_v4 = vld [vmem:[#allocation5 + $0x1c8] sm:$0xff]  ;;  %v1633_v6 = vcombine.low %v64_v58, %v80_v59  ;;  %v1668_v7 = vcombine.high %v97_v1, %v113_v2  ;;  %v81_v10 = vld [vmem:[#allocation5 + $0xc0] sm:$0xff]  ;;  %v1667_v13 = vcombine.low %v97_v1, %v113_v2  ;;  %v115_v18 = vld [vmem:[#allocation5 + $0x1d0] sm:$0xff] }
  0x34   :  { %709 = vmatprep.subr.bf16.mxu0 %v1624_v30  ;;  %750 = vmatprep.subr.bf16.mxu1 %v1626_v31  ;;  %v1670_v8 = vcombine.high %v98_v3, %v114_v4  ;;  %v66_v11 = vld [vmem:[#allocation5 + $0x48] sm:$0xff]  ;;  %v1669_v14 = vcombine.low %v98_v3, %v114_v4  ;;  %v1636_v15 = vcombine.high %v65_v9, %v81_v10  ;;  %v100_v19 = vld [vmem:[#allocation5 + $0x158] sm:$0xff]  ;;  %v67_v25 = vld [vmem:[#allocation5 + $0x50] sm:$0xff] }
  0x35   :  { %727 = vmatprep.mubr.bf16.mxu0 %v1884_v0  ;;  %768 = vmatprep.mubr.bf16.mxu1 %v1884_v0  ;;  %v82_v12 = vld [vmem:[#allocation5 + $0xc8] sm:$0xff]  ;;  %v116_v20 = vld [vmem:[#allocation5 + $0x1d8] sm:$0xff]  ;;  %v1635_v21 = vcombine.low %v65_v9, %v81_v10  ;;  %v1672_v23 = vcombine.high %v99_v17, %v115_v18  ;;  %v83_v26 = vld [vmem:[#allocation5 + $0xd0] sm:$0xff]  ;;  %v1671_v30 = vcombine.low %v99_v17, %v115_v18 }
  0x36   :  { %v1638_v16 = vcombine.high %v66_v11, %v82_v12  ;;  %v1637_v22 = vcombine.low %v66_v11, %v82_v12  ;;  %v1674_v24 = vcombine.high %v100_v19, %v116_v20  ;;  %v68_v28 = vld [vmem:[#allocation5 + $0x58] sm:$0xff]  ;;  %v1673_v31 = vcombine.low %v100_v19, %v116_v20  ;;  %v101_v34 = vld [vmem:[#allocation5 + $0x160] sm:$0xff]  ;;  %v103_v50 = vld [vmem:[#allocation5 + $0x170] sm:$0xff] }
  0x37   :  { %710 = vmatpush1.bf16.msra.mxu0 %v1623_v36  ;;  %751 = vmatpush1.bf16.msra.mxu1 %v1625_v37  ;;  %v84_v29 = vld [vmem:[#allocation5 + $0xd8] sm:$0xff]  ;;  %v1640_v32 = vcombine.high %v67_v25, %v83_v26  ;;  %v117_v35 = vld [vmem:[#allocation5 + $0x1e0] sm:$0xff]  ;;  %v102_v36 = vld [vmem:[#allocation5 + $0x168] sm:$0xff] }
  0x38   :  { %789 = vmatprep.subr.bf16.mxu0 %v1660_v38  ;;  %830 = vmatprep.subr.bf16.mxu1 %v1662_v39  ;;  %v1642_v33 = vcombine.high %v68_v28, %v84_v29  ;;  %v118_v37 = vld [vmem:[#allocation5 + $0x1e8] sm:$0xff]  ;;  %v1639_v38 = vcombine.low %v67_v25, %v83_v26  ;;  %v1641_v39 = vcombine.low %v68_v28, %v84_v29  ;;  %v69_v42 = vld [vmem:[#allocation5 + $0x60] sm:$0xff]  ;;  %v119_v51 = vld [vmem:[#allocation5 + $0x1f0] sm:$0xff] }
  0x39   :  { %v1676_v40 = vcombine.high %v101_v34, %v117_v35  ;;  %v1678_v41 = vcombine.high %v102_v36, %v118_v37  ;;  %v85_v43 = vld [vmem:[#allocation5 + $0xe0] sm:$0xff]  ;;  %v1680_v56 = vcombine.high %v103_v50, %v119_v51  ;;  %v71_v58 = vld [vmem:[#allocation5 + $0x70] sm:$0xff] }
  0x3a   :  { %1685 = vmatmul.mubr.msk.bf16.vlgmr.msra.gmra.mxu0 %vm609_vm0, %v1923_v27  ;;  %1686 = vmatmul.mubr.msk.bf16.vlgmr.msra.gmra.mxu1 %vm609_vm0, %v1923_v27  ;;  %v1644_v48 = vcombine.high %v69_v42, %v85_v43  ;;  %v87_v59 = vld [vmem:[#allocation5 + $0xf0] sm:$0xff] }
  0x3b   :  { %790 = vmatpush1.bf16.msra.mxu0 %v1659_v44  ;;  %831 = vmatpush1.bf16.msra.mxu1 %v1661_v45  ;;  %v70_v44 = vld [vmem:[#allocation5 + $0x68] sm:$0xff]  ;;  %v1648_v1 = vcombine.high %v71_v58, %v87_v59  ;;  %v1647_v3 = vcombine.low %v71_v58, %v87_v59 }
  0x3c   :  { %791 = vmatprep.subr.bf16.mxu0 %v1628_v46  ;;  %832 = vmatprep.subr.bf16.mxu1 %v1630_v47  ;;  %v86_v45 = vld [vmem:[#allocation5 + $0xe8] sm:$0xff]  ;;  %v1675_v46 = vcombine.low %v101_v34, %v117_v35  ;;  %v1677_v47 = vcombine.low %v102_v36, %v118_v37 }
  0x3d   :  { %809 = vmatprep.mubr.bf16.mxu0 %v1884_v0  ;;  %850 = vmatprep.mubr.bf16.mxu1 %v1884_v0  ;;  %v1646_v49 = vcombine.high %v70_v44, %v86_v45 }
  0x3f   :  { %792 = vmatpush1.bf16.msra.mxu0 %v1627_v52  ;;  %833 = vmatpush1.bf16.msra.mxu1 %v1629_v53  ;;  %v104_v52 = vld [vmem:[#allocation5 + $0x178] sm:$0xff] }
  0x40   :  { %871 = vmatprep.subr.bf16.mxu0 %v1664_v54  ;;  %912 = vmatprep.subr.bf16.mxu1 %v1666_v55  ;;  %v120_v53 = vld [vmem:[#allocation5 + $0x1f8] sm:$0xff]  ;;  %v1643_v54 = vcombine.low %v69_v42, %v85_v43  ;;  %v1645_v55 = vcombine.low %v70_v44, %v86_v45 }
  0x41   :  { %v1682_v57 = vcombine.high %v104_v52, %v120_v53 }
  0x42   :  { %1687 = vmatmul.mubr.msk.bf16.vlgmr.msra.gmra.mxu0 %vm609_vm0, %v1923_v27  ;;  %1688 = vmatmul.mubr.msk.bf16.vlgmr.msra.gmra.mxu1 %vm609_vm0, %v1923_v27 }
  0x43   :  { %872 = vmatpush1.bf16.msra.mxu0 %v1663_v60  ;;  %913 = vmatpush1.bf16.msra.mxu1 %v1665_v61  ;;  %v72_v60 = vld [vmem:[#allocation5 + $0x78] sm:$0xff] }
  0x44   :  { %873 = vmatprep.subr.bf16.mxu0 %v1632_v62  ;;  %914 = vmatprep.subr.bf16.mxu1 %v1634_v63  ;;  %v88_v61 = vld [vmem:[#allocation5 + $0xf8] sm:$0xff]  ;;  %v1679_v62 = vcombine.low %v103_v50, %v119_v51  ;;  %v1681_v63 = vcombine.low %v104_v52, %v120_v53 }
  0x45   :  { %891 = vmatprep.mubr.bf16.mxu0 %v1884_v0  ;;  %932 = vmatprep.mubr.bf16.mxu1 %v1884_v0  ;;  %v1650_v2 = vcombine.high %v72_v60, %v88_v61  ;;  %v1649_v4 = vcombine.low %v72_v60, %v88_v61 }
  0x47   :  { %874 = vmatpush1.bf16.msra.mxu0 %v1631_v5  ;;  %915 = vmatpush1.bf16.msra.mxu1 %v1633_v6  ;;  %v129_v5 = vlaneseq }
  0x48   :  { %953 = vmatprep.subr.bf16.mxu0 %v1668_v7  ;;  %994 = vmatprep.subr.bf16.mxu1 %v1670_v8  ;;  %v121_v8 = vld [vmem:[#allocation7] sm:$0xff] }
  0x49   :  { %v130_v6 = vshrl.u32 %v129_v5, 7 }
  0x4a   :  { %1689 = vmatmul.mubr.msk.bf16.vlgmr.msra.gmra.mxu0 %vm609_vm0, %v1923_v27  ;;  %1690 = vmatmul.mubr.msk.bf16.vlgmr.msra.gmra.mxu1 %vm609_vm0, %v1923_v27 }
  0x4b   :  { %954 = vmatpush1.bf16.msra.mxu0 %v1667_v13  ;;  %995 = vmatpush1.bf16.msra.mxu1 %v1669_v14  ;;  %v1971_v7 = vsub.s32 0, %v130_v6  ;;  %v1973_v9 = vsub.s32 2, %v130_v6  ;;  %v1975_v10 = vsub.s32 1, %v130_v6  ;;  %v1977_v11 = vsub.s32 3, %v130_v6 }
  0x4c   :  { %955 = vmatprep.subr.bf16.mxu0 %v1636_v15  ;;  %996 = vmatprep.subr.bf16.mxu1 %v1638_v16  ;;  %v1983_v17 = vsub.s32 4, %v130_v6  ;;  %v1985_v20 = vsub.s32 6, %v130_v6  ;;  %v1989_v26 = vsub.s32 7, %v130_v6 }
  0x4d   :  { %973 = vmatprep.mubr.bf16.mxu0 %v1884_v0  ;;  %1014 = vmatprep.mubr.bf16.mxu1 %v1884_v0  ;;  %v140_v12 = vrot.slane %v121_v8, %v1973_v9  ;;  %v136_v13 = vrot.slane %v121_v8, %v1975_v10 }
  0x4e   :  { %v156_v37 = vrot.slane %v121_v8, %v1985_v20  ;;  %v160_v43 = vrot.slane %v121_v8, %v1989_v26 }
  0x4f   :  { %956 = vmatpush1.bf16.msra.mxu0 %v1635_v21  ;;  %997 = vmatpush1.bf16.msra.mxu1 %v1637_v22 }
  0x50   :  { %1035 = vmatprep.subr.bf16.mxu0 %v1672_v23  ;;  %1076 = vmatprep.subr.bf16.mxu1 %v1674_v24  ;;  %v1987_v23 = vsub.s32 5, %v130_v6 }
  0x52   :  { %1691 = vmatmul.mubr.msk.bf16.vlgmr.msra.gmra.mxu0 %vm609_vm0, %v1923_v27  ;;  %1692 = vmatmul.mubr.msk.bf16.vlgmr.msra.gmra.mxu1 %vm609_vm0, %v1923_v27 }
  0x53   :  { %1036 = vmatpush1.bf16.msra.mxu0 %v1671_v30  ;;  %1077 = vmatpush1.bf16.msra.mxu1 %v1673_v31 }
  0x54   :  { %1037 = vmatprep.subr.bf16.mxu0 %v1640_v32  ;;  %1078 = vmatprep.subr.bf16.mxu1 %v1642_v33  ;;  %v148_v32 = vrot.slane %v121_v8, %v1983_v17 }
  0x55   :  { %1055 = vmatprep.mubr.bf16.mxu0 %v1884_v0  ;;  %1096 = vmatprep.mubr.bf16.mxu1 %v1884_v0 }
  0x57   :  { %1038 = vmatpush1.bf16.msra.mxu0 %v1639_v38  ;;  %1079 = vmatpush1.bf16.msra.mxu1 %v1641_v39 }
  0x58   :  { %1117 = vmatprep.subr.bf16.mxu0 %v1676_v40  ;;  %1158 = vmatprep.subr.bf16.mxu1 %v1678_v41  ;;  %v152_v40 = vrot.slane %v121_v8, %v1987_v23 }
  0x5a   :  { %1693 = vmatmul.mubr.msk.bf16.vlgmr.msra.gmra.mxu0 %vm609_vm0, %v1923_v27  ;;  %1694 = vmatmul.mubr.msk.bf16.vlgmr.msra.gmra.mxu1 %vm609_vm0, %v1923_v27 }
  0x5b   :  { %1118 = vmatpush1.bf16.msra.mxu0 %v1675_v46  ;;  %1159 = vmatpush1.bf16.msra.mxu1 %v1677_v47 }
  0x5c   :  { %1119 = vmatprep.subr.bf16.mxu0 %v1644_v48  ;;  %1160 = vmatprep.subr.bf16.mxu1 %v1646_v49  ;;  %v122_v48 = vld [vmem:[#allocation7 + $0x8] sm:$0xff] }
  0x5d   :  { %1137 = vmatprep.mubr.bf16.mxu0 %v1884_v0  ;;  %1178 = vmatprep.mubr.bf16.mxu1 %v1884_v0  ;;  %v176_v5 = vrot.slane %v122_v48, %v1977_v11 }
  0x5f   :  { %1120 = vmatpush1.bf16.msra.mxu0 %v1643_v54  ;;  %1161 = vmatpush1.bf16.msra.mxu1 %v1645_v55 }
  0x60   :  { %1199 = vmatprep.subr.bf16.mxu0 %v1680_v56  ;;  %1240 = vmatprep.subr.bf16.mxu1 %v1682_v57  ;;  %v164_v57 = vrot.slane %v122_v48, %v1971_v7 }
  0x62   :  { %1695 = vmatmul.mubr.msk.bf16.vlgmr.msra.gmra.mxu0 %vm609_vm0, %v1923_v27  ;;  %1696 = vmatmul.mubr.msk.bf16.vlgmr.msra.gmra.mxu1 %vm609_vm0, %v1923_v27 }
  0x63   :  { %1200 = vmatpush1.bf16.msra.mxu0 %v1679_v62  ;;  %1241 = vmatpush1.bf16.msra.mxu1 %v1681_v63  ;;  %v172_v62 = vrot.slane %v122_v48, %v1973_v9 }
  0x64   :  { %1201 = vmatprep.subr.bf16.mxu0 %v1648_v1  ;;  %1242 = vmatprep.subr.bf16.mxu1 %v1650_v2  ;;  %v168_v2 = vrot.slane %v122_v48, %v1975_v10 }
  0x65   :  { %1219 = vmatprep.mubr.bf16.mxu0 %v1884_v0  ;;  %1260 = vmatprep.mubr.bf16.mxu1 %v1884_v0  ;;  %v132_v0 = vrot.slane %v121_v8, %v1971_v7 }
  0x67   :  { %1202 = vmatpush1.bf16.msra.mxu0 %v1647_v3  ;;  %1243 = vmatpush1.bf16.msra.mxu1 %v1649_v4 }
  0x6a   :  { %1697 = vmatmul.mubr.msk.bf16.vlgmr.msra.gmra.mxu0 %vm609_vm0, %v1923_v27  ;;  %1698 = vmatmul.mubr.msk.bf16.vlgmr.msra.gmra.mxu1 %vm609_vm0, %v1923_v27  ;;  %v144_v27 = vrot.slane %v121_v8, %v1977_v11 }
  0xf2   :  { %v647_v14 = vpop.f32.mrf.mxu0  ;;  %v688_v16 = vpop.f32.mrf.mxu1 }
  0xf3   :  { %v648_v15 = vadd.f32 %v647_v14, %v132_v0  ;;  %v689_v18 = vadd.f32 %v688_v16, %v140_v12 }
  0xf4   :  { %v649_v19 = vpop.f32.mrf.mxu0  ;;  %v690_v22 = vpop.f32.mrf.mxu1 }
  0xf5   :  { %v650_v21 = vadd.f32 %v649_v19, %v136_v13  ;;  %v691_v24 = vadd.f32 %v690_v22, %v144_v27  ;;  %v1413_v28 = vmax.f32 %v648_v15, 0.0  ;;  %v1415_v33 = vmax.f32 %v689_v18, 0.0 }
  0xf6   :  { %v651_v25 = vpop.f32.mrf.mxu0  ;;  %v692_v31 = vpop.f32.mrf.mxu1  ;;  %v180_v22 = vrot.slane %v122_v48, %v1983_v17 }
  0xf7   :  { %v1731_v29 = vpack.c.bf16 %v650_v21, %v648_v15  ;;  %v1414_v30 = vmax.f32 %v650_v21, 0.0  ;;  %v1732_v34 = vpack.c.bf16 %v691_v24, %v689_v18  ;;  %v1416_v35 = vmax.f32 %v691_v24, 0.0 }
  0xf8   :  { %v652_v36 = vpop.f32.mrf.mxu0  ;;  %v693_v39 = vpop.f32.mrf.mxu1 }
  0xf9   :  { %1397 = vst [vmem:[#allocation8] sm:$0xff] %v1731_v29  ;;  %v1747_v38 = vpack.c.bf16 %v1414_v30, %v1413_v28  ;;  %1398 = vst [vmem:[#allocation8 + $0x8] sm:$0xff] %v1732_v34  ;;  %v1748_v41 = vpack.c.bf16 %v1416_v35, %v1415_v33  ;;  %v188_v30 = vrot.slane %v122_v48, %v1985_v20 }
  0xfa   :  { %v729_v42 = vpop.f32.mrf.mxu0  ;;  %v770_v45 = vpop.f32.mrf.mxu1  ;;  %v184_v33 = vrot.slane %v122_v48, %v1987_v23  ;;  %v192_v36 = vrot.slane %v122_v48, %v1989_v26 }
  0xfb   :  { %1573 = vst [vmem:[#allocation9] sm:$0xff] %v1747_v38  ;;  %v730_v44 = vadd.f32 %v729_v42, %v148_v32  ;;  %1574 = vst [vmem:[#allocation9 + $0x8] sm:$0xff] %v1748_v41  ;;  %v771_v46 = vadd.f32 %v770_v45, %v156_v37  ;;  %v123_v41 = vld [vmem:[#allocation7 + $0x10] sm:$0xff] }
  0xfc   :  { %v731_v47 = vpop.f32.mrf.mxu0  ;;  %v772_v50 = vpop.f32.mrf.mxu1 }
  0xfd   :  { %v732_v49 = vadd.f32 %v731_v47, %v152_v40  ;;  %v773_v51 = vadd.f32 %v772_v50, %v160_v43  ;;  %v1417_v53 = vmax.f32 %v730_v44, 0.0  ;;  %v1419_v58 = vmax.f32 %v771_v46, 0.0 }
  0xfe   :  { %v733_v52 = vpop.f32.mrf.mxu0  ;;  %v774_v56 = vpop.f32.mrf.mxu1 }
  0xff   :  { %v1733_v54 = vpack.c.bf16 %v732_v49, %v730_v44  ;;  %v1418_v55 = vmax.f32 %v732_v49, 0.0  ;;  %v1734_v59 = vpack.c.bf16 %v773_v51, %v771_v46  ;;  %v1420_v60 = vmax.f32 %v773_v51, 0.0 }
 0x100   :  { %v734_v61 = vpop.f32.mrf.mxu0  ;;  %v775_v1 = vpop.f32.mrf.mxu1  ;;  %v196_v51 = vrot.slane %v123_v41, %v1971_v7 }
 0x101   :  { %1399 = vst [vmem:[#allocation8 + $0x10] sm:$0xff] %v1733_v54  ;;  %v1749_v63 = vpack.c.bf16 %v1418_v55, %v1417_v53  ;;  %1400 = vst [vmem:[#allocation8 + $0x18] sm:$0xff] %v1734_v59  ;;  %v1750_v3 = vpack.c.bf16 %v1420_v60, %v1419_v58  ;;  %v204_v55 = vrot.slane %v123_v41, %v1973_v9 }
 0x102   :  { %v811_v4 = vpop.f32.mrf.mxu0  ;;  %v852_v8 = vpop.f32.mrf.mxu1  ;;  %v200_v58 = vrot.slane %v123_v41, %v1975_v10  ;;  %v208_v61 = vrot.slane %v123_v41, %v1977_v11 }
 0x103   :  { %1575 = vst [vmem:[#allocation9 + $0x10] sm:$0xff] %v1749_v63  ;;  %v812_v6 = vadd.f32 %v811_v4, %v164_v57  ;;  %1576 = vst [vmem:[#allocation9 + $0x18] sm:$0xff] %v1750_v3  ;;  %v853_v0 = vadd.f32 %v852_v8, %v172_v62 }
 0x104   :  { %v813_v12 = vpop.f32.mrf.mxu0  ;;  %v854_v14 = vpop.f32.mrf.mxu1 }
 0x105   :  { %v814_v13 = vadd.f32 %v813_v12, %v168_v2  ;;  %v855_v27 = vadd.f32 %v854_v14, %v176_v5  ;;  %v1421_v16 = vmax.f32 %v812_v6, 0.0  ;;  %v1423_v24 = vmax.f32 %v853_v0, 0.0 }
 0x106   :  { %v815_v15 = vpop.f32.mrf.mxu0  ;;  %v856_v21 = vpop.f32.mrf.mxu1  ;;  %v212_v14 = vrot.slane %v123_v41, %v1983_v17 }
 0x107   :  { %v1735_v18 = vpack.c.bf16 %v814_v13, %v812_v6  ;;  %v1422_v19 = vmax.f32 %v814_v13, 0.0  ;;  %v1736_v25 = vpack.c.bf16 %v855_v27, %v853_v0  ;;  %v1424_v28 = vmax.f32 %v855_v27, 0.0 }
 0x108   :  { %v816_v29 = vpop.f32.mrf.mxu0  ;;  %v857_v32 = vpop.f32.mrf.mxu1 }
 0x109   :  { %1401 = vst [vmem:[#allocation8 + $0x20] sm:$0xff] %v1735_v18  ;;  %v1751_v31 = vpack.c.bf16 %v1422_v19, %v1421_v16  ;;  %1402 = vst [vmem:[#allocation8 + $0x28] sm:$0xff] %v1736_v25  ;;  %v1752_v34 = vpack.c.bf16 %v1424_v28, %v1423_v24  ;;  %v220_v19 = vrot.slane %v123_v41, %v1985_v20 }
 0x10a   :  { %v893_v35 = vpop.f32.mrf.mxu0  ;;  %v934_v38 = vpop.f32.mrf.mxu1  ;;  %v216_v24 = vrot.slane %v123_v41, %v1987_v23  ;;  %v224_v29 = vrot.slane %v123_v41, %v1989_v26 }
 0x10b   :  { %1577 = vst [vmem:[#allocation9 + $0x20] sm:$0xff] %v1751_v31  ;;  %v894_v37 = vadd.f32 %v893_v35, %v180_v22  ;;  %1578 = vst [vmem:[#allocation9 + $0x28] sm:$0xff] %v1752_v34  ;;  %v935_v39 = vadd.f32 %v934_v38, %v188_v30  ;;  %v124_v34 = vld [vmem:[#allocation7 + $0x18] sm:$0xff] }
 0x10c   :  { %v895_v40 = vpop.f32.mrf.mxu0  ;;  %v936_v43 = vpop.f32.mrf.mxu1 }
 0x10d   :  { %v896_v42 = vadd.f32 %v895_v40, %v184_v33  ;;  %v937_v44 = vadd.f32 %v936_v43, %v192_v36  ;;  %v1425_v46 = vmax.f32 %v894_v37, 0.0  ;;  %v1427_v52 = vmax.f32 %v935_v39, 0.0 }
 0x10e   :  { %v897_v45 = vpop.f32.mrf.mxu0  ;;  %v938_v50 = vpop.f32.mrf.mxu1 }
 0x10f   :  { %v1737_v47 = vpack.c.bf16 %v896_v42, %v894_v37  ;;  %v1426_v49 = vmax.f32 %v896_v42, 0.0  ;;  %v1738_v53 = vpack.c.bf16 %v937_v44, %v935_v39  ;;  %v1428_v48 = vmax.f32 %v937_v44, 0.0 }
 0x110   :  { %v898_v54 = vpop.f32.mrf.mxu0  ;;  %v939_v57 = vpop.f32.mrf.mxu1  ;;  %v228_v44 = vrot.slane %v124_v34, %v1971_v7 }
 0x111   :  { %1403 = vst [vmem:[#allocation8 + $0x30] sm:$0xff] %v1737_v47  ;;  %v1753_v56 = vpack.c.bf16 %v1426_v49, %v1425_v46  ;;  %1404 = vst [vmem:[#allocation8 + $0x38] sm:$0xff] %v1738_v53  ;;  %v1754_v59 = vpack.c.bf16 %v1428_v48, %v1427_v52  ;;  %v236_v49 = vrot.slane %v124_v34, %v1973_v9 }
 0x112   :  { %v975_v60 = vpop.f32.mrf.mxu0  ;;  %v1016_v63 = vpop.f32.mrf.mxu1  ;;  %v232_v52 = vrot.slane %v124_v34, %v1975_v10  ;;  %v240_v54 = vrot.slane %v124_v34, %v1977_v11  ;;  %v244_v10 = vrot.slane %v124_v34, %v1983_v17 }
 0x113   :  { %1579 = vst [vmem:[#allocation9 + $0x30] sm:$0xff] %v1753_v56  ;;  %v976_v62 = vadd.f32 %v975_v60, %v196_v51  ;;  %1580 = vst [vmem:[#allocation9 + $0x38] sm:$0xff] %v1754_v59  ;;  %v1017_v1 = vadd.f32 %v1016_v63, %v204_v55 }
 0x114   :  { %v977_v2 = vpop.f32.mrf.mxu0  ;;  %v1018_v4 = vpop.f32.mrf.mxu1 }
 0x115   :  { %v978_v3 = vadd.f32 %v977_v2, %v200_v58  ;;  %v1019_v5 = vadd.f32 %v1018_v4, %v208_v61  ;;  %v1429_v8 = vmax.f32 %v976_v62, 0.0  ;;  %v1431_v27 = vmax.f32 %v1017_v1, 0.0 }
 0x116   :  { %v979_v6 = vpop.f32.mrf.mxu0  ;;  %v1020_v13 = vpop.f32.mrf.mxu1 }
 0x117   :  { %v1739_v0 = vpack.c.bf16 %v978_v3, %v976_v62  ;;  %v1430_v12 = vmax.f32 %v978_v3, 0.0  ;;  %v1740_v15 = vpack.c.bf16 %v1019_v5, %v1017_v1  ;;  %v1432_v16 = vmax.f32 %v1019_v5, 0.0 }
 0x118   :  { %v980_v18 = vpop.f32.mrf.mxu0  ;;  %v1021_v22 = vpop.f32.mrf.mxu1  ;;  %v252_v5 = vrot.slane %v124_v34, %v1985_v20 }
 0x119   :  { %1405 = vst [vmem:[#allocation8 + $0x40] sm:$0xff] %v1739_v0  ;;  %v1755_v21 = vpack.c.bf16 %v1430_v12, %v1429_v8  ;;  %1406 = vst [vmem:[#allocation8 + $0x48] sm:$0xff] %v1740_v15  ;;  %v1756_v25 = vpack.c.bf16 %v1432_v16, %v1431_v27  ;;  %v248_v0 = vrot.slane %v124_v34, %v1987_v23 }
 0x11a   :  { %v1057_v28 = vpop.f32.mrf.mxu0  ;;  %v1098_v31 = vpop.f32.mrf.mxu1 }
 0x11b   :  { %1581 = vst [vmem:[#allocation9 + $0x40] sm:$0xff] %v1755_v21  ;;  %v1058_v30 = vadd.f32 %v1057_v28, %v212_v14  ;;  %1582 = vst [vmem:[#allocation9 + $0x48] sm:$0xff] %v1756_v25  ;;  %v1099_v32 = vadd.f32 %v1098_v31, %v220_v19  ;;  %v256_v14 = vrot.slane %v124_v34, %v1989_v26 }
 0x11c   :  { %v1059_v33 = vpop.f32.mrf.mxu0  ;;  %v1100_v36 = vpop.f32.mrf.mxu1 }
 0x11d   :  { %v1060_v35 = vadd.f32 %v1059_v33, %v216_v24  ;;  %v1101_v37 = vadd.f32 %v1100_v36, %v224_v29  ;;  %v1433_v39 = vmax.f32 %v1058_v30, 0.0  ;;  %v1435_v45 = vmax.f32 %v1099_v32, 0.0 }
 0x11e   :  { %v1061_v38 = vpop.f32.mrf.mxu0  ;;  %v1102_v43 = vpop.f32.mrf.mxu1 }
 0x11f   :  { %v1741_v40 = vpack.c.bf16 %v1060_v35, %v1058_v30  ;;  %v1434_v42 = vmax.f32 %v1060_v35, 0.0  ;;  %v1742_v46 = vpack.c.bf16 %v1101_v37, %v1099_v32  ;;  %v1436_v41 = vmax.f32 %v1101_v37, 0.0 }
 0x120   :  { %v1062_v47 = vpop.f32.mrf.mxu0  ;;  %v1103_v51 = vpop.f32.mrf.mxu1 }
 0x121   :  { %1407 = vst [vmem:[#allocation8 + $0x50] sm:$0xff] %v1741_v40  ;;  %v1757_v50 = vpack.c.bf16 %v1434_v42, %v1433_v39  ;;  %1408 = vst [vmem:[#allocation8 + $0x58] sm:$0xff] %v1742_v46  ;;  %v1758_v53 = vpack.c.bf16 %v1436_v41, %v1435_v45 }
 0x122   :  { %v1139_v48 = vpop.f32.mrf.mxu0  ;;  %v1180_v56 = vpop.f32.mrf.mxu1 }
 0x123   :  { %1583 = vst [vmem:[#allocation9 + $0x50] sm:$0xff] %v1757_v50  ;;  %v1140_v55 = vadd.f32 %v1139_v48, %v228_v44  ;;  %1584 = vst [vmem:[#allocation9 + $0x58] sm:$0xff] %v1758_v53  ;;  %v1181_v7 = vadd.f32 %v1180_v56, %v236_v49 }
 0x124   :  { %v1141_v57 = vpop.f32.mrf.mxu0  ;;  %v1182_v59 = vpop.f32.mrf.mxu1 }
 0x125   :  { %v1142_v58 = vadd.f32 %v1141_v57, %v232_v52  ;;  %v1183_v60 = vadd.f32 %v1182_v59, %v240_v54  ;;  %v1437_v61 = vmax.f32 %v1140_v55, 0.0  ;;  %v1439_v2 = vmax.f32 %v1181_v7, 0.0 }
 0x126   :  { %v1143_v9 = vpop.f32.mrf.mxu0  ;;  %v1184_v1 = vpop.f32.mrf.mxu1 }
 0x127   :  { %v1743_v62 = vpack.c.bf16 %v1142_v58, %v1140_v55  ;;  %v1438_v63 = vmax.f32 %v1142_v58, 0.0  ;;  %v1744_v3 = vpack.c.bf16 %v1183_v60, %v1181_v7  ;;  %v1440_v4 = vmax.f32 %v1183_v60, 0.0 }
 0x128   :  { %v1144_v11 = vpop.f32.mrf.mxu0  ;;  %v1185_v8 = vpop.f32.mrf.mxu1 }
 0x129   :  { %1409 = vst [vmem:[#allocation8 + $0x60] sm:$0xff] %v1743_v62  ;;  %v1759_v6 = vpack.c.bf16 %v1438_v63, %v1437_v61  ;;  %1410 = vst [vmem:[#allocation8 + $0x68] sm:$0xff] %v1744_v3  ;;  %v1760_v12 = vpack.c.bf16 %v1440_v4, %v1439_v2 }
 0x12a   :  { %v1221_v13 = vpop.f32.mrf.mxu0  ;;  %v1262_v15 = vpop.f32.mrf.mxu1 }
 0x12b   :  { %1585 = vst [vmem:[#allocation9 + $0x60] sm:$0xff] %v1759_v6  ;;  %v1222_v27 = vadd.f32 %v1221_v13, %v244_v10  ;;  %1586 = vst [vmem:[#allocation9 + $0x68] sm:$0xff] %v1760_v12  ;;  %v1263_v17 = vadd.f32 %v1262_v15, %v252_v5 }
 0x12c   :  { %v1223_v16 = vpop.f32.mrf.mxu0  ;;  %v1264_v19 = vpop.f32.mrf.mxu1 }
 0x12d   :  { %v1224_v18 = vadd.f32 %v1223_v16, %v248_v0  ;;  %v1265_v20 = vadd.f32 %v1264_v19, %v256_v14  ;;  %v1441_v22 = vmax.f32 %v1222_v27, 0.0  ;;  %v1443_v28 = vmax.f32 %v1263_v17, 0.0 }
 0x12e   :  { %v1225_v21 = vpop.f32.mrf.mxu0  ;;  %v1266_v25 = vpop.f32.mrf.mxu1 }
 0x12f   :  { %v1745_v24 = vpack.c.bf16 %v1224_v18, %v1222_v27  ;;  %v1442_v23 = vmax.f32 %v1224_v18, 0.0  ;;  %v1746_v26 = vpack.c.bf16 %v1265_v20, %v1263_v17  ;;  %v1444_v29 = vmax.f32 %v1265_v20, 0.0 }
 0x130   :  { %v1226_v30 = vpop.f32.mrf.mxu0  ;;  %v1267_v32 = vpop.f32.mrf.mxu1 }
 0x131   :  { %1411 = vst [vmem:[#allocation8 + $0x70] sm:$0xff] %v1745_v24  ;;  %v1761_v31 = vpack.c.bf16 %v1442_v23, %v1441_v22  ;;  %1412 = vst [vmem:[#allocation8 + $0x78] sm:$0xff] %v1746_v26  ;;  %v1762_v33 = vpack.c.bf16 %v1444_v29, %v1443_v28 }
 0x133   :  { %1587 = vst [vmem:[#allocation9 + $0x70] sm:$0xff] %v1761_v31 }
 0x134   :  { %1842 = shalt.err (!%p1839_p5)
}
 0x135   :  { %1598 = dma.vmem_to_hbm [thread:$0]  %s1596_s2, 2048, %s2028_s3, [#allocation4]   ;;  %1588 = vst [vmem:[#allocation9 + $0x78] sm:$0xff] %v1762_v33 }
 0x136   :  { %s1851_s10 = scalar_lea.vmem %s1606_s6, 2048  ;;  %p1856_p7 = scmp.lt.s32.totalorder %s1606_s6, %s1606_s6 }
 0x137   :  { %p1852_p6 = scmp.ne.s32.totalorder %s1606_s6, %s1851_s10  ;;  %p1857_p8 = scmp.lt.s32.totalorder %s1851_s10, %s1851_s10 }
 0x139   :  { %p1858_p9 = por %p1857_p8, %p1856_p7 }
 0x13b   :  { %p1859_p10 = pnand %p1858_p9, %p1852_p6 }
 0x13d   :  { %1862 = shalt.err (!%p1859_p10)
}
 0x13e   :  { %1608 = dma.vmem_to_hbm [thread:$0]  %s1606_s6, 2048, %s2029_s4, [#allocation10]  }
 0x13f   :  { %1875 = dma.done.wait [#allocation4], 2048  }
 0x140   :  { %1876 = vsyncadd [#allocation4], 4294965248 }
 0x141   :  { %1877 = dma.done.wait [#allocation10], 2048  }
 0x142   :  { %1878 = vsyncadd [#allocation10], 4294965248 }
 0x143   :  { %1615 = vsyncpa [#allocation3], 1 }
 0x144   :  { %1616 = vsyncpa [#allocation6], 1 }
 0x145   :  { %1617 = vsyncpa [#allocation4], 1 }
 0x146   :  { %1618 = vsyncpa [#allocation10], 1 }

</bundles_post_ra>
